<compile_context>
chip_gen: v5e
topology: v5e:2x2
jax: 0.10.0
libtpu: 0.0.40
codegen_flags: <defaults>
</compile_context>

<pallas_src>
import functools

import jax
import jax.numpy as jnp
from jax.experimental import pallas as pl
from jax.experimental.pallas import tpu as pltpu


def _round_up(a, b):
    return (a + b - 1) // b * b


def _output_layer_kernel(x_ref, w_ref, b_ref, mu_ref, pi_ref, theta_ref, *, tn):
    # x_ref: (tm, H) compute dtype; w_ref: (H, 3*tn) compute dtype;
    # b_ref: (1, 3*tn) f32; outputs: (tm, tn) each.
    x = x_ref[...]

    # One wide matmul for all three heads; f32 accumulation + f32 bias add.
    y = jnp.dot(x, w_ref[...], preferred_element_type=jnp.float32) + b_ref[...]

    mu_lin = y[:, 0 * tn:1 * tn]
    pi_lin = y[:, 1 * tn:2 * tn]
    th_lin = y[:, 2 * tn:3 * tn]

    # mean head: Linear -> ReLU
    mu_ref[...] = jnp.maximum(mu_lin, 0.0).astype(mu_ref.dtype)

    # pi head: Linear -> Sigmoid (numerically stable; reciprocal on the EUP,
    # which is idle next to the MXU).
    ez_pi = jnp.exp(-jnp.abs(pi_lin))
    r = pl.reciprocal(1.0 + ez_pi, approx=True)
    pi_ref[...] = jnp.where(pi_lin >= 0, r, ez_pi * r).astype(pi_ref.dtype)

    # theta head: Linear -> Softplus (stable: max(z,0) + log1p(exp(-|z|)))
    sp = jnp.maximum(th_lin, 0.0) + jnp.log1p(jnp.exp(-jnp.abs(th_lin)))
    theta_ref[...] = sp.astype(theta_ref.dtype)


def output_layer(x, w_mu, b_mu, w_pi, b_pi, w_th, b_th, *,
                 block_m=None, block_n=None, compute_dtype=jnp.bfloat16):
    """x: (B, H); w_*: (H, O) (pre-transposed vs. nn.Linear); b_*: (O,).

    Returns (mu, pi, theta), each (B, O) in x.dtype.
    For zero_inflation=False simply drop the pi head from the returned tuple.
    """
    B, H = x.shape
    O = w_mu.shape[1]
    out_dtype = x.dtype

    # Lane-dense output tile (multiple of 128); batch tile multiple of 8.
    if block_n is None:
        block_n = 512 if O >= 512 else (256 if O >= 256 else 128)
    if block_m is None:
        block_m = min(256, _round_up(B, 8))
    O_pad = _round_up(O, block_n)
    B_pad = _round_up(B, block_m)
    nj = O_pad // block_n

    # Pad batch + cast activations to the streaming dtype.
    x_p = jnp.pad(x, ((0, B_pad - B), (0, 0))).astype(compute_dtype)

    # Pack the three head weights per output tile: (H, nj, 3, tn) -> (H, 3*O_pad)
    # so the BlockSpec column block j is exactly [Wmu_j | Wpi_j | Wth_j].
    def pack_w(w):
        w = jnp.pad(w, ((0, 0), (0, O_pad - O))).astype(compute_dtype)
        return w.reshape(H, nj, block_n)

    w_packed = jnp.stack([pack_w(w_mu), pack_w(w_pi), pack_w(w_th)], axis=2)
    w_packed = w_packed.reshape(H, 3 * O_pad)

    def pack_b(b):
        b = jnp.pad(b, (0, O_pad - O)).astype(jnp.float32)
        return b.reshape(nj, block_n)

    b_packed = jnp.stack([pack_b(b_mu), pack_b(b_pi), pack_b(b_th)], axis=1)
    b_packed = b_packed.reshape(1, 3 * O_pad)

    grid = (B_pad // block_m, nj)
    out_shape = jax.ShapeDtypeStruct((B_pad, O_pad), out_dtype)
    kernel = functools.partial(_output_layer_kernel, tn=block_n)

    mu, pi, theta = pl.pallas_call(
        kernel,
        grid=grid,
        in_specs=[
            pl.BlockSpec((block_m, H), lambda i, j: (i, 0)),         # x tile
            pl.BlockSpec((H, 3 * block_n), lambda i, j: (0, j)),     # packed W
            pl.BlockSpec((1, 3 * block_n), lambda i, j: (0, j)),     # packed b
        ],
        out_specs=[
            pl.BlockSpec((block_m, block_n), lambda i, j: (i, j)),   # mu
            pl.BlockSpec((block_m, block_n), lambda i, j: (i, j)),   # pi
            pl.BlockSpec((block_m, block_n), lambda i, j: (i, j)),   # theta
        ],
        out_shape=(out_shape, out_shape, out_shape),
        compiler_params=pltpu.CompilerParams(
            dimension_semantics=("parallel", "parallel"),
            vmem_limit_bytes=48 * 1024 * 1024),
    )(x_p, w_packed, b_packed)

    # TODO(synk): add a K (hidden) grid axis + f32 accumulator scratch (init /
    # finalize via pl.when) if H grows to many thousands, so the (H, 3*tn)
    # weight block stays within v7x's 64 MiB VMEM.
    return mu[:B, :O], pi[:B, :O], theta[:B, :O]


def _init_linear(key, in_features, out_features):
    # Matches nn.Linear default init: U(-1/sqrt(in), 1/sqrt(in)).
    kw, kb = jax.random.split(key)
    bound = 1.0 / (in_features ** 0.5)
    w = jax.random.uniform(kw, (in_features, out_features),
                           minval=-bound, maxval=bound, dtype=jnp.float32)
    b = jax.random.uniform(kb, (out_features,),
                           minval=-bound, maxval=bound, dtype=jnp.float32)
    return w, b


def _reference(x, w_mu, b_mu, w_pi, b_pi, w_th, b_th):
    mu = jax.nn.relu(x @ w_mu + b_mu)
    pi = jax.nn.sigmoid(x @ w_pi + b_pi)
    theta = jax.nn.softplus(x @ w_th + b_th)
    return mu, pi, theta


if __name__ == "__main__":
    # features = (last_hidden, output_size)
    last_hidden, output_size = 32, 16
    batch = 8

    key = jax.random.PRNGKey(0)
    kx, kmu, kpi, kth = jax.random.split(key, 4)

    x = jax.random.normal(kx, (batch, last_hidden), dtype=jnp.float32)
    w_mu, b_mu = _init_linear(kmu, last_hidden, output_size)
    w_pi, b_pi = _init_linear(kpi, last_hidden, output_size)
    w_th, b_th = _init_linear(kth, last_hidden, output_size)

    mu, pi, theta = output_layer(x, w_mu, b_mu, w_pi, b_pi, w_th, b_th)
    jax.block_until_ready((mu, pi, theta))

    mu_r, pi_r, theta_r = _reference(x, w_mu, b_mu, w_pi, b_pi, w_th, b_th)
    # Tolerance loosened vs the f32 reference because x / weights are streamed
    # as bf16 (accumulation is f32).
    assert jnp.allclose(mu, mu_r, atol=5e-2, rtol=5e-2), float(jnp.max(jnp.abs(mu - mu_r)))
    assert jnp.allclose(pi, pi_r, atol=5e-2, rtol=5e-2), float(jnp.max(jnp.abs(pi - pi_r)))
    assert jnp.allclose(theta, theta_r, atol=5e-2, rtol=5e-2), float(jnp.max(jnp.abs(theta - theta_r)))

    print("KERNEL_OK")
</pallas_src>

<mosaic_0001>
module attributes {stable_mosaic.version = 11 : i64} {
  func.func @_output_layer_kernel(%arg0: i32, %arg1: i32, %arg2: memref<8x32xbf16, #tpu.memory_space<vmem>>, %arg3: memref<32x384xbf16, #tpu.memory_space<vmem>>, %arg4: memref<1x384xf32, #tpu.memory_space<vmem>>, %arg5: memref<8x128xf32, #tpu.memory_space<vmem>>, %arg6: memref<8x128xf32, #tpu.memory_space<vmem>>, %arg7: memref<8x128xf32, #tpu.memory_space<vmem>>) attributes {dimension_semantics = [#tpu.dimension_semantics<parallel>, #tpu.dimension_semantics<parallel>], iteration_bounds = array<i64: 1, 1>, scalar_prefetch = 0 : i64, scratch_operands = 0 : i64, tpu.core_type = #tpu.core_type<tc>, window_params = [{transform_indices = @transform_0, window_bounds = array<i64: 8, 32>}, {transform_indices = @transform_1, window_bounds = array<i64: 32, 384>}, {transform_indices = @transform_2, window_bounds = array<i64: 1, 384>}, {transform_indices = @transform_3, window_bounds = array<i64: 8, 128>}, {transform_indices = @transform_4, window_bounds = array<i64: 8, 128>}, {transform_indices = @transform_5, window_bounds = array<i64: 8, 128>}]} {
    %c0 = arith.constant 0 : index
    %c0_0 = arith.constant 0 : index
    %0 = vector.load %arg2[%c0, %c0_0] : memref<8x32xbf16, #tpu.memory_space<vmem>>, vector<8x32xbf16>
    %c0_1 = arith.constant 0 : index
    %c0_2 = arith.constant 0 : index
    %1 = vector.load %arg3[%c0_1, %c0_2] : memref<32x384xbf16, #tpu.memory_space<vmem>>, vector<32x384xbf16>
    %cst = arith.constant dense<0.000000e+00> : vector<8x384xf32>
    %2 = tpu.matmul %0, %1, %cst {dimension_numbers = #tpu.dot_dimension_numbers<[1], [0], [0], [1], [0, 0, 1, 1], [], []>} : vector<8x32xbf16>, vector<32x384xbf16>, vector<8x384xf32> -> vector<8x384xf32>
    %c0_3 = arith.constant 0 : index
    %c0_4 = arith.constant 0 : index
    %3 = vector.load %arg4[%c0_3, %c0_4] : memref<1x384xf32, #tpu.memory_space<vmem>>, vector<1x384xf32>
    %4 = vector.broadcast %3 : vector<1x384xf32> to vector<8x384xf32>
    %5 = arith.addf %2, %4 : vector<8x384xf32>
    %6 = vector.extract_strided_slice %5 {offsets = [0, 0], sizes = [8, 128], strides = [1, 1]} : vector<8x384xf32> to vector<8x128xf32>
    %7 = vector.extract_strided_slice %5 {offsets = [0, 128], sizes = [8, 128], strides = [1, 1]} : vector<8x384xf32> to vector<8x128xf32>
    %8 = vector.extract_strided_slice %5 {offsets = [0, 256], sizes = [8, 128], strides = [1, 1]} : vector<8x384xf32> to vector<8x128xf32>
    %cst_5 = arith.constant 0.000000e+00 : f32
    %9 = vector.broadcast %cst_5 : f32 to vector<8x128xf32>
    %10 = arith.maximumf %6, %9 : vector<8x128xf32>
    %c0_6 = arith.constant 0 : index
    %c0_7 = arith.constant 0 : index
    %11 = vector.load %arg5[%c0_6, %c0_7] : memref<8x128xf32, #tpu.memory_space<vmem>>, vector<8x128xf32>
    tpu.vector_store %arg5[%c0_6, %c0_7], %10 {strides = array<i32>} : memref<8x128xf32, #tpu.memory_space<vmem>>, vector<8x128xf32>,
    %12 = math.absf %7 : vector<8x128xf32>
    %cst_8 = arith.constant 0.000000e+00 : f32
    %13 = vector.broadcast %cst_8 : f32 to vector<8x128xf32>
    %14 = arith.subf %13, %12 : vector<8x128xf32>
    %15 = math.exp %14 : vector<8x128xf32>
    %cst_9 = arith.constant 1.000000e+00 : f32
    %16 = vector.broadcast %cst_9 : f32 to vector<8x128xf32>
    %17 = arith.addf %16, %15 : vector<8x128xf32>
    %18 = tpu.reciprocal %17 {approx = true} : vector<8x128xf32> -> vector<8x128xf32>
    %cst_10 = arith.constant 0.000000e+00 : f32
    %19 = vector.broadcast %cst_10 : f32 to vector<8x128xf32>
    %20 = arith.cmpf oge, %7, %19 : vector<8x128xf32>
    %21 = arith.mulf %15, %18 : vector<8x128xf32>
    %22 = arith.select %20, %18, %21 : vector<8x128xi1>, vector<8x128xf32>
    %c0_11 = arith.constant 0 : index
    %c0_12 = arith.constant 0 : index
    %23 = vector.load %arg6[%c0_11, %c0_12] : memref<8x128xf32, #tpu.memory_space<vmem>>, vector<8x128xf32>
    tpu.vector_store %arg6[%c0_11, %c0_12], %22 {strides = array<i32>} : memref<8x128xf32, #tpu.memory_space<vmem>>, vector<8x128xf32>,
    %cst_13 = arith.constant 0.000000e+00 : f32
    %24 = vector.broadcast %cst_13 : f32 to vector<8x128xf32>
    %25 = arith.maximumf %8, %24 : vector<8x128xf32>
    %26 = math.absf %8 : vector<8x128xf32>
    %cst_14 = arith.constant 0.000000e+00 : f32
    %27 = vector.broadcast %cst_14 : f32 to vector<8x128xf32>
    %28 = arith.subf %27, %26 : vector<8x128xf32>
    %29 = math.exp %28 : vector<8x128xf32>
    %30 = math.log1p %29 : vector<8x128xf32>
    %31 = arith.addf %25, %30 : vector<8x128xf32>
    %c0_15 = arith.constant 0 : index
    %c0_16 = arith.constant 0 : index
    %32 = vector.load %arg7[%c0_15, %c0_16] : memref<8x128xf32, #tpu.memory_space<vmem>>, vector<8x128xf32>
    tpu.vector_store %arg7[%c0_15, %c0_16], %31 {strides = array<i32>} : memref<8x128xf32, #tpu.memory_space<vmem>>, vector<8x128xf32>,
    return
  }
  func.func @transform_0(%arg0: i32, %arg1: i32) -> (i32, i32) {
    %c0_i32 = arith.constant 0 : i32
    %c0_i32_0 = arith.constant 0 : i32
    return %arg0, %c0_i32 : i32, i32
  }
  func.func @transform_1(%arg0: i32, %arg1: i32) -> (i32, i32) {
    %c0_i32 = arith.constant 0 : i32
    %c0_i32_0 = arith.constant 0 : i32
    return %c0_i32, %arg1 : i32, i32
  }
  func.func @transform_2(%arg0: i32, %arg1: i32) -> (i32, i32) {
    %c0_i32 = arith.constant 0 : i32
    %c0_i32_0 = arith.constant 0 : i32
    return %c0_i32, %arg1 : i32, i32
  }
  func.func @transform_3(%arg0: i32, %arg1: i32) -> (i32, i32) {
    %c0_i32 = arith.constant 0 : i32
    return %arg0, %arg1 : i32, i32
  }
  func.func @transform_4(%arg0: i32, %arg1: i32) -> (i32, i32) {
    %c0_i32 = arith.constant 0 : i32
    return %arg0, %arg1 : i32, i32
  }
  func.func @transform_5(%arg0: i32, %arg1: i32) -> (i32, i32) {
    %c0_i32 = arith.constant 0 : i32
    return %arg0, %arg1 : i32, i32
  }
}

</mosaic_0001>

<bundles_post_ra>
// kernel: tpu_custom_call.1
= control target key start
LH: loop header
LB: loop body
LE: loop exit
PB: predicated region body
PF: predicated region fallthrough
CT: control target
= control target key end

     0   :  { %11 = vsyncpa [#allocation3], 0  ;;  %s489_s0 = inlined_call_operand.hbm [shape: bf16[8,32], index: 0, kind: input, shape index: {}]   ;;  %s490_s1 = inlined_call_operand.hbm [shape: bf16[32,384], index: 1, kind: input, shape index: {}]   ;;  %s491_s2 = inlined_call_operand.hbm [shape: f32[1,384], index: 2, kind: input, shape index: {}]   ;;  %s492_s3 = inlined_call_operand.hbm [shape: f32[8,128], index: 3, kind: output, shape index: {0}]   ;;  %s493_s4 = inlined_call_operand.hbm [shape: f32[8,128], index: 4, kind: output, shape index: {1}]   ;;  %s494_s5 = inlined_call_operand.hbm [shape: f32[8,128], index: 5, kind: output, shape index: {2}]  }
   0x1   :  { %12 = vsyncpa [#allocation6], 0 }
   0x2   :  { %13 = vsyncpa [#allocation4], 0  ;;  %s30_s20 = sshll.u32 %s490_s1, 4  ;;  %s31_s20 = int_to_ptr.hbm [resolvable:$true] %s30_s20 }
   0x3   :  { %14 = vsyncpa [#allocation10], 0  ;;  %s433_s21 = smov [#allocation5]   ;;  %s20_s25 = sshll.u32 %s489_s0, 4  ;;  %s21_s25 = int_to_ptr.hbm [resolvable:$true] %s20_s25 }
   0x4   :  { %s32_s22 = sshll.u32 %s433_s21, 4  ;;  %s434_s26 = smov 192   ;;  %s33_s22 = int_to_ptr.vmem [resolvable:$true] %s32_s22 }
   0x5   :  { %s435_s27 = smov 12   ;;  %s436_s28 = smov [#allocation2]  }
   0x6   :  { %38 = dma.hbm_to_vmem [thread:$0]  %s31_s20, 768, %s33_s22, [#allocation6], %s434_s26, %s434_s26, %s435_s27  }
   0x7   :  { %s22_s29 = sshll.u32 %s436_s28, 4  ;;  %s44_s7 = sshll.u32 %s491_s2, 4  ;;  %s23_s29 = int_to_ptr.vmem [resolvable:$true] %s22_s29  ;;  %s45_s7 = int_to_ptr.hbm [resolvable:$true] %s44_s7 }
   0x8   :  { %25 = dma.hbm_to_vmem [thread:$0]  %s21_s25, 64, %s23_s29, [#allocation3]  }
   0x9   :  { %s437_s1 = smov [#allocation7]  }
   0xa   :  { %s46_s8 = sshll.u32 %s437_s1, 4  ;;  %s47_s8 = int_to_ptr.vmem [resolvable:$true] %s46_s8 }
   0xb   :  { %49 = dma.hbm_to_vmem [thread:$0]  %s45_s7, 48, %s47_s8, [#allocation6]  }
   0xc   :  { %425 = dma.done.wait [#allocation3], 64  }
   0xd   :  { %426 = vsyncadd [#allocation3], 4294967232 }
   0xe   :  { %427 = dma.done.wait [#allocation6], 816  }
   0xf   :  { %428 = vsyncadd [#allocation6], 4294966480  ;;  %v262_v0 = vld [vmem:[#allocation5 + $0x1c] sm:$0xf]  ;;  %v248_v1 = vld [vmem:[#allocation5 + $0x24] sm:$0xf0] }
  0x10   :  { %v254_v2 = vld [vmem:[#allocation5 + $0x20] sm:$0xf]  ;;  %v251_v3 = vor.u32 %v262_v0, %v248_v1  ;;  %v264_v4 = vld [vmem:[#allocation5 + $0x28] sm:$0xf0]  ;;  %v259_v5 = vld [vmem:[#allocation5 + $0x4] sm:$0xf] }
  0x11   :  { %v236_v6 = vld [vmem:[#allocation5 + $0xc] sm:$0xf0]  ;;  %v255_v7 = vor.u32 %v264_v4, %v254_v2  ;;  %v242_v8 = vld [vmem:[#allocation5 + $0x8] sm:$0xf]  ;;  %v261_v9 = vld [vmem:[#allocation5 + $0x10] sm:$0xf0] }
  0x12   :  { %135 = vmatpush.bf16.msra.mxu1 %v251_v3  ;;  %v239_v10 = vor.u32 %v259_v5, %v236_v6  ;;  %v246_v11 = vld [vmem:[#allocation5 + $0x18] sm:$0xf]  ;;  %v263_v12 = vld [vmem:[#allocation5 + $0x20] sm:$0xf0]  ;;  %v234_v13 = vld [vmem:[#allocation5] sm:$0xf]  ;;  %v243_v14 = vor.u32 %v261_v9, %v242_v8 }
  0x13   :  { %148 = vmatpush.bf16.msra.mxu2 %v255_v7  ;;  %v247_v15 = vor.u32 %v263_v12, %v246_v11  ;;  %v260_v16 = vld [vmem:[#allocation5 + $0x8] sm:$0xf0]  ;;  %v63_v18 = vld [vmem:[#allocation2] sm:$0xf]  ;;  %vm112_vm0 = vcmask 261120   ;;  %s438_s0 = smov [#allocation8]  }
  0x14   :  { %v235_v17 = vor.u32 %v260_v16, %v234_v13  ;;  %v72_v19 = vld [vmem:[#allocation7] sm:$0x7]  ;;  %s188_s2 = sshll.u32 %s438_s0, 4  ;;  %s190_s11 = sshll.u32 %s492_s3, 4  ;;  %s189_s2 = int_to_ptr.vmem [resolvable:$true] %s188_s2  ;;  %s191_s11 = int_to_ptr.hbm [resolvable:$true] %s190_s11 }
  0x15   :  { %122 = vmatpush.bf16.msra.mxu0 %v247_v15  ;;  %v75_v20 = vperm.slane %v72_v19, 1  ;;  %v74_v22 = vperm.slane %v72_v19, 0  ;;  %v76_v26 = vperm.slane %v72_v19, 2  ;;  %s439_s3 = smov [#allocation9]   ;;  %s201_s15 = sshll.u32 %s493_s4, 4  ;;  %s202_s15 = int_to_ptr.hbm [resolvable:$true] %s201_s15 }
  0x16   :  { %136 = vmatpush.bf16.msra.mxu1 %v239_v10  ;;  %s199_s12 = sshll.u32 %s439_s3, 4  ;;  %s440_s16 = smov [#allocation11]   ;;  %s200_s12 = int_to_ptr.vmem [resolvable:$true] %s199_s12 }
  0x17   :  { %149 = vmatpush.bf16.msra.mxu2 %v243_v14  ;;  %s210_s17 = sshll.u32 %s440_s16, 4  ;;  %s212_s4 = sshll.u32 %s494_s5, 4  ;;  %s211_s17 = int_to_ptr.vmem [resolvable:$true] %s210_s17  ;;  %s213_s4 = int_to_ptr.hbm [resolvable:$true] %s212_s4 }
  0x19   :  { %257 = vmatmul.msk.bf16.vlgmr.msra.gmra.mxu1 %vm112_vm0, %v63_v18  ;;  %123 = vmatpush.bf16.msra.mxu0 %v235_v17 }
  0x1a   :  { %258 = vmatmul.msk.bf16.vlgmr.msra.gmra.mxu2 %vm112_vm0, %v63_v18 }
  0x1c   :  { %256 = vmatmul.msk.bf16.vlgmr.msra.gmra.mxu0 %vm112_vm0, %v63_v18 }
  0x96   :  { %v138_v21 = vpop.f32.mrf.mxu1 }
  0x97   :  { %v139_v23 = vadd.f32 %v138_v21, %v75_v20 }
  0x99   :  { %v157_v24 = vand.u32 2147483647, %v139_v23  ;;  %v125_v25 = vpop.f32.mrf.mxu0  ;;  %vm163_vm1 = vcmp.ge.f32.partialorder %v139_v23, 0.0 }
  0x9a   :  { %v126_v27 = vadd.f32 %v125_v25, %v74_v22 }
  0x9b   :  { %v158_v28 = vsub.f32 0.0, %v157_v24 }
  0x9c   :  { %v155_v29 = vmax.f32 %v126_v27, 0.0 }
  0x9d   :  { %v159_v30 = vmul.f32 1.442695, %v158_v28  ;;  %v151_v31 = vpop.f32.mrf.mxu2 }
  0x9e   :  { %v152_v32 = vadd.f32 %v151_v31, %v76_v26  ;;  %v140_v33 = vpop.f32.mrf.mxu1  ;;  %156 = vst [vmem:[#allocation8] sm:$0xff] %v155_v29 }
  0x9f   :  { %273 = vpow2.f32 %v159_v30  ;;  %193 = dma.vmem_to_hbm [thread:$0]  %s189_s2, 128, %s191_s11, [#allocation4]  }
  0xa0   :  { %v168_v34 = vand.u32 2147483647, %v152_v32  ;;  %v167_v52 = vmax.f32 %v152_v32, 0.0 }
  0xa1   :  { %v127_v35 = vpop.f32.mrf.mxu0 }
  0xa2   :  { %v169_v36 = vsub.f32 0.0, %v168_v34 }
  0xa4   :  { %v170_v37 = vmul.f32 1.442695, %v169_v36 }
  0xa5   :  { %v274_v38 = vpop.eup %273  ;;  %v153_v39 = vpop.f32.mrf.mxu2 }
  0xa6   :  { %v161_v40 = vadd.f32 1.0, %v274_v38  ;;  %275 = vpow2.f32 %v170_v37 }
  0xa8   :  { %277 = vrcp.f32 %v161_v40 }
  0xac   :  { %v276_v41 = vpop.eup %275 }
  0xad   :  { %v172_v42 = vadd.f32 1.0, %v276_v41  ;;  %v175_v44 = vmul.f32 -0.5, %v276_v41  ;;  %v178_v48 = vand.u32 2147483647, %v276_v41 }
  0xae   :  { %v278_v43 = vpop.eup %277 }
  0xaf   :  { %279 = vlog2.f32 %v172_v42  ;;  %v164_v45 = vmul.f32 %v278_v43, %v274_v38  ;;  %v176_v47 = vadd.f32 1.0, %v175_v44  ;;  %vm179_vm2 = vcmp.lt.f32.partialorder %v178_v48, 0.0004427343 }
  0xb1   :  { %v165_v46 = vsel %vm163_vm1, %v278_v43, %v164_v45  ;;  %v177_v51 = vmul.f32 %v276_v41, %v176_v47 }
  0xb2   :  { %166 = vst [vmem:[#allocation9] sm:$0xff] %v165_v46 }
  0xb3   :  { %204 = dma.vmem_to_hbm [thread:$0]  %s200_s12, 128, %s202_s15, [#allocation10]  }
  0xb5   :  { %v280_v49 = vpop.eup %279 }
  0xb6   :  { %v174_v50 = vmul.f32 0.6931472, %v280_v49 }
  0xb8   :  { %v180_v53 = vsel %vm179_vm2, %v177_v51, %v174_v50 }
  0xb9   :  { %v181_v54 = vadd.f32 %v180_v53, %v167_v52 }
  0xbb   :  { %182 = vst [vmem:[#allocation11] sm:$0xff] %v181_v54 }
  0xbc   :  { %215 = dma.vmem_to_hbm [thread:$0]  %s211_s17, 128, %s213_s4, [#allocation10]  }
  0xbd   :  { %429 = dma.done.wait [#allocation4], 128  }
  0xbe   :  { %430 = vsyncadd [#allocation4], 4294967168 }
  0xbf   :  { %431 = dma.done.wait [#allocation10], 256  }
  0xc0   :  { %432 = vsyncadd [#allocation10], 4294967040 }
  0xc1   :  { %228 = vsyncpa [#allocation3], 1 }
  0xc2   :  { %229 = vsyncpa [#allocation6], 1 }
  0xc3   :  { %230 = vsyncpa [#allocation4], 1 }
  0xc4   :  { %231 = vsyncpa [#allocation10], 1 }

</bundles_post_ra>
